<compile_context>
chip_gen: v5e
topology: v5e:2x2
jax: 0.10.0
libtpu: 0.0.40
codegen_flags: <defaults>
</compile_context>

<pallas_src>
import math

import jax
import jax.numpy as jnp
from jax.experimental import pallas as pl
from jax.experimental.pallas import tpu as pltpu


def _pe_add_kernel(x_ref, omega_ref, phase_ref, o_ref):
    # x_ref / o_ref : (tL, N*D) tile covering global rows [l*tL, l*tL + tL)
    # omega_ref     : (1, N*D)  per-lane frequency  w[d],  d = lane % D
    # phase_ref     : (1, N*D)  per-lane phase start[n]*w[d] + (-pi/2 if d even)
    tl, width = x_ref.shape
    row0 = pl.program_id(0) * tl
    rows = (row0 + jax.lax.broadcasted_iota(jnp.int32, (tl, width), 0)).astype(
        jnp.float32
    )
    # angle = (global_row + start[n]) * omega[d] + shift[d]
    angle = rows * omega_ref[...] + phase_ref[...]
    pe = jnp.cos(angle)  # single transcendental per element (EUP slot)
    o_ref[...] = (x_ref[...].astype(jnp.float32) + pe).astype(o_ref.dtype)


def _pick_row_tile(L, width, itemsize, budget_bytes=16 << 20, cap=1024):
    """Largest multiple-of-8 row tile s.t. double-buffered in+out <= budget."""
    # 2 input buffers + 2 output buffers per tile.
    tl = budget_bytes // max(1, 4 * width * itemsize)
    tl = min(tl, cap, L)
    tl = max((tl // 8) * 8, 8)
    if tl >= L:
        return L  # full extent -> always a legal block dim
    return tl


def positional_encoding_forward(x, start):
    """x: (L, N, D) float, start: (N,) int -> (L, N, D)."""
    L, N, D = x.shape
    assert D % 2 == 0, "d_model must be even (as in the PyTorch module)"
    width = N * D

    # Free reshape (contiguous, no data movement) -- no transposes.
    x2 = x.reshape(L, width)

    # Tiny per-lane constant rows (O(N*D) wrapper work, negligible).
    d_idx = jnp.tile(jnp.arange(D, dtype=jnp.int32), N)        # lane -> d
    n_idx = jnp.repeat(jnp.arange(N, dtype=jnp.int32), D)      # lane -> n
    omega = jnp.exp(
        ((d_idx // 2) * 2).astype(jnp.float32) * (-math.log(10000.0) / D)
    )
    # sin(a) = cos(a - pi/2): fold the even/odd select into a phase shift.
    shift = jnp.where(d_idx % 2 == 0, -jnp.pi / 2, 0.0).astype(jnp.float32)
    phase = start.astype(jnp.float32)[n_idx] * omega + shift
    omega_row = omega.reshape(1, width)
    phase_row = phase.reshape(1, width)

    itemsize = jnp.dtype(x.dtype).itemsize
    tl = _pick_row_tile(L, width, itemsize)
    grid = (pl.cdiv(L, tl),)

    out2 = pl.pallas_call(
        _pe_add_kernel,
        out_shape=jax.ShapeDtypeStruct((L, width), x.dtype),
        grid_spec=pltpu.PrefetchScalarGridSpec(
            num_scalar_prefetch=0,
            grid=grid,
            in_specs=[
                pl.BlockSpec((tl, width), lambda l: (l, 0)),   # x row tile
                pl.BlockSpec((1, width), lambda l: (0, 0)),    # omega (VMEM-resident)
                pl.BlockSpec((1, width), lambda l: (0, 0)),    # phase (VMEM-resident)
            ],
            out_specs=pl.BlockSpec((tl, width), lambda l: (l, 0)),
        ),
        compiler_params=pltpu.CompilerParams(
            dimension_semantics=("parallel",),
            vmem_limit_bytes=32 * 1024 * 1024,
        ),
    )(x2, omega_row, phase_row)

    return out2.reshape(L, N, D)  # free reshape back


def _reference(x, start):
    """Pure-JAX reference mirroring the PyTorch module (dropout p=0)."""
    L, N, D = x.shape
    max_len = 5000
    position = jnp.arange(max_len, dtype=jnp.float32)[:, None]
    div_term = jnp.exp(
        jnp.arange(0, D, 2, dtype=jnp.float32) * (-math.log(10000.0) / D)
    )
    pe = jnp.zeros((max_len, D), dtype=jnp.float32)
    pe = pe.at[:, 0::2].set(jnp.sin(position * div_term))
    pe = pe.at[:, 1::2].set(jnp.cos(position * div_term))
    idx = start[None, :] + jnp.arange(L)[:, None]  # (L, N)
    return x + pe[idx]                             # (L, N, D)


if __name__ == "__main__":
    L, N, D = 8, 2, 32  # seq, batch, d_model

    key = jax.random.PRNGKey(0)
    kx, ks = jax.random.split(key)
    x = jax.random.normal(kx, (L, N, D), dtype=jnp.float32)
    start = jax.random.randint(ks, (N,), 0, 100, dtype=jnp.int32)

    out = positional_encoding_forward(x, start)
    out = jax.block_until_ready(out)

    ref = _reference(x, start)
    assert out.shape == (L, N, D)
    assert jnp.allclose(out, ref, atol=1e-4, rtol=1e-5), "mismatch vs reference"

    print("KERNEL_OK")
</pallas_src>

<mosaic_0001>
module attributes {stable_mosaic.version = 11 : i64} {
  func.func @_pe_add_kernel(%arg0: i32, %arg1: memref<8x64xf32, #tpu.memory_space<vmem>>, %arg2: memref<1x64xf32, #tpu.memory_space<vmem>>, %arg3: memref<1x64xf32, #tpu.memory_space<vmem>>, %arg4: memref<8x64xf32, #tpu.memory_space<vmem>>) attributes {dimension_semantics = [#tpu.dimension_semantics<parallel>], iteration_bounds = array<i64: 1>, scalar_prefetch = 0 : i64, scratch_operands = 0 : i64, tpu.core_type = #tpu.core_type<tc>, window_params = [{transform_indices = @transform_0, window_bounds = array<i64: 8, 64>}, {pipeline_mode = #tpu.pipeline_mode<synchronous>, transform_indices = @transform_1, window_bounds = array<i64: 1, 64>}, {pipeline_mode = #tpu.pipeline_mode<synchronous>, transform_indices = @transform_2, window_bounds = array<i64: 1, 64>}, {transform_indices = @transform_3, window_bounds = array<i64: 8, 64>}]} {
    %c8_i32 = arith.constant 8 : i32
    %0 = arith.muli %arg0, %c8_i32 : i32
    %1 = tpu.iota {dimensions = array<i32: 0>} : vector<8x64xi32>
    %2 = vector.broadcast %0 : i32 to vector<8x64xi32>
    %3 = arith.addi %2, %1 : vector<8x64xi32>
    %4 = arith.sitofp %3 : vector<8x64xi32> to vector<8x64xf32>
    %c0 = arith.constant 0 : index
    %c0_0 = arith.constant 0 : index
    %5 = vector.load %arg2[%c0, %c0_0] : memref<1x64xf32, #tpu.memory_space<vmem>>, vector<1x64xf32>
    %6 = vector.broadcast %5 : vector<1x64xf32> to vector<8x64xf32>
    %7 = arith.mulf %4, %6 : vector<8x64xf32>
    %c0_1 = arith.constant 0 : index
    %c0_2 = arith.constant 0 : index
    %8 = vector.load %arg3[%c0_1, %c0_2] : memref<1x64xf32, #tpu.memory_space<vmem>>, vector<1x64xf32>
    %9 = vector.broadcast %8 : vector<1x64xf32> to vector<8x64xf32>
    %10 = arith.addf %7, %9 : vector<8x64xf32>
    %11 = math.cos %10 : vector<8x64xf32>
    %c0_3 = arith.constant 0 : index
    %c0_4 = arith.constant 0 : index
    %12 = vector.load %arg1[%c0_3, %c0_4] : memref<8x64xf32, #tpu.memory_space<vmem>>, vector<8x64xf32>
    %13 = arith.addf %12, %11 : vector<8x64xf32>
    %c0_5 = arith.constant 0 : index
    %c0_6 = arith.constant 0 : index
    %14 = vector.load %arg4[%c0_5, %c0_6] : memref<8x64xf32, #tpu.memory_space<vmem>>, vector<8x64xf32>
    tpu.vector_store %arg4[%c0_5, %c0_6], %13 {strides = array<i32>} : memref<8x64xf32, #tpu.memory_space<vmem>>, vector<8x64xf32>,
    return
  }
  func.func @transform_0(%arg0: i32) -> (i32, i32) {
    %c0_i32 = arith.constant 0 : i32
    %c0_i32_0 = arith.constant 0 : i32
    return %arg0, %c0_i32 : i32, i32
  }
  func.func @transform_1(%arg0: i32) -> (i32, i32) {
    %c0_i32 = arith.constant 0 : i32
    %c0_i32_0 = arith.constant 0 : i32
    %c0_i32_1 = arith.constant 0 : i32
    return %c0_i32, %c0_i32_0 : i32, i32
  }
  func.func @transform_2(%arg0: i32) -> (i32, i32) {
    %c0_i32 = arith.constant 0 : i32
    %c0_i32_0 = arith.constant 0 : i32
    %c0_i32_1 = arith.constant 0 : i32
    return %c0_i32, %c0_i32_0 : i32, i32
  }
  func.func @transform_3(%arg0: i32) -> (i32, i32) {
    %c0_i32 = arith.constant 0 : i32
    %c0_i32_0 = arith.constant 0 : i32
    return %arg0, %c0_i32 : i32, i32
  }
}

</mosaic_0001>

<bundles_post_ra>
// kernel: tpu_custom_call.1
= control target key start
LH: loop header
LB: loop body
LE: loop exit
PB: predicated region body
PF: predicated region fallthrough
CT: control target
= control target key end

     0   :  { %8 = vsyncpa [#allocation3], 0  ;;  %s424_s0 = inlined_call_operand.hbm [shape: f32[8,64], index: 0, kind: input, shape index: {}]   ;;  %s425_s1 = inlined_call_operand.hbm [shape: f32[1,64], index: 1, kind: input, shape index: {}]   ;;  %s426_s2 = inlined_call_operand.vmem [shape: f32[1,64], index: 2, kind: input, shape index: {}]   ;;  %s427_s3 = inlined_call_operand.hbm [shape: f32[8,64], index: 3, kind: output, shape index: {}]  }
   0x1   :  { %9 = vsyncpa [#allocation6], 0 }
   0x2   :  { %10 = vsyncpa [#allocation4], 0  ;;  %s16_s14 = sshll.u32 %s424_s0, 4  ;;  %s328_s15 = smov [#allocation2]   ;;  %s17_s14 = int_to_ptr.hbm [resolvable:$true] %s16_s14 }
   0x3   :  { %s18_s16 = sshll.u32 %s328_s15, 4  ;;  %s27_s19 = sshll.u32 %s425_s1, 4  ;;  %s19_s16 = int_to_ptr.vmem [resolvable:$true] %s18_s16  ;;  %s28_s19 = int_to_ptr.hbm [resolvable:$true] %s27_s19 }
   0x4   :  { %21 = dma.hbm_to_vmem [thread:$0]  %s17_s14, 128, %s19_s16, [#allocation3]  }
   0x5   :  { %s329_s20 = smov [#allocation5]  }
   0x6   :  { %s29_s21 = sshll.u32 %s329_s20, 4  ;;  %s30_s21 = int_to_ptr.vmem [resolvable:$true] %s29_s21 }
   0x7   :  { %32 = dma.hbm_to_vmem [thread:$0]  %s28_s19, 16, %s30_s21, [#allocation6]  }
   0x8   :  { %322 = dma.done.wait [#allocation3], 128  }
   0x9   :  { %323 = vsyncadd [#allocation3], 4294967168 }
   0xa   :  { %324 = dma.done.wait [#allocation6], 16  }
   0xb   :  { %325 = vsyncadd [#allocation6], 4294967280  ;;  %v44_v0 = vlaneseq  ;;  %v248_v3 = vld [vmem:[#allocation5] ss:$0 sm:$0xff]  ;;  %v249_v4 = vld [vmem:[%s426_s2] ss:$0 sm:$0xff] }
   0xc   :  { %v330_v18 = vmov 683565275   ;;  %v331_v20 = vmov 2475754826   ;;  %v332_v22 = vmov 2131351028  }
   0xd   :  { %v45_v1 = vshrl.u32 %v44_v0, 7  ;;  %v333_v24 = vmov 2102212464   ;;  %v334_v26 = vmov 920167782   ;;  %s337_s1 = smov [#allocation7]  }
   0xe   :  { %v335_v32 = vmov 1326507024   ;;  %s222_s2 = sshll.u32 %s337_s1, 4  ;;  %s224_s25 = sshll.u32 %s427_s3, 4  ;;  %s223_s2 = int_to_ptr.vmem [resolvable:$true] %s222_s2  ;;  %s225_s25 = int_to_ptr.hbm [resolvable:$true] %s224_s25 }
   0xf   :  { %v48_v2 = vcvt.s32.f32 %v45_v1 }
  0x11   :  { %v53_v5 = vmul.f32 %v248_v3, %v48_v2 }
  0x13   :  { %v367_v6 = vadd.f32 %v249_v4, %v53_v5 }
  0x15   :  { %v62_v7 = vand.u32 2139095040, %v367_v6  ;;  %v59_v9 = vand.u32 2147483647, %v367_v6  ;;  %vm61_vm12 = vcmp.lt.s32.totalorder %v367_v6, 0 }
  0x17   :  { %v63_v8 = vshrl.u32 %v62_v7, 23  ;;  %v66_v12 = vand.u32 8388607, %v59_v9  ;;  %v336_v7 = vmov 0   ;;  %vm411_vm13 = vcmp.le.f32.partialorder %v59_v9, 0.7853982 }
  0x19   :  { %v235_v10 = vadd.s32 4294967169, %v63_v8  ;;  %v67_v15 = vor.u32 8388608, %v66_v12 }
  0x1b   :  { %v69_v11 = vadd.s32 1, %v235_v10  ;;  %v376_v34 = vshll.u32 %v67_v15, 8 }
  0x1d   :  { %vm70_vm0 = vcmp.gt.s32.totalorder %v69_v11, 0  ;;  %v108_v46 = vand.u32 65535, %v376_v34  ;;  %v109_v47 = vshrl.u32 %v376_v34, 16 }
  0x1e   :  { %v71_v13 = vsel %vm70_vm0, %v69_v11, 0 }
  0x1f   :  { %v73_v14 = vand.u32 31, %v71_v13  ;;  %v373_v16 = vshrl.u32 %v71_v13, 5 }
  0x21   :  { %v74_v17 = vsub.s32 32, %v73_v14  ;;  %v76_v19 = vshll.u32 %v330_v18, %v73_v14  ;;  %v79_v21 = vshll.u32 %v331_v20, %v73_v14  ;;  %v82_v23 = vshll.u32 %v332_v22, %v73_v14 }
  0x22   :  { %v85_v25 = vshll.u32 %v333_v24, %v73_v14  ;;  %v88_v27 = vshll.u32 %v334_v26, %v73_v14  ;;  %vm91_vm1 = vcmp.lt.s32.totalorder %v373_v16, 1  ;;  %vm94_vm2 = vcmp.lt.s32.totalorder %v373_v16, 4 }
  0x23   :  { %v77_v28 = vshrl.u32 %v331_v20, %v74_v17  ;;  %v80_v29 = vshrl.u32 %v332_v22, %v74_v17  ;;  %v83_v30 = vshrl.u32 %v333_v24, %v74_v17  ;;  %v86_v31 = vshrl.u32 %v334_v26, %v74_v17 }
  0x24   :  { %v89_v33 = vshrl.u32 %v335_v32, %v74_v17  ;;  %vm93_vm3 = vcmp.lt.s32.totalorder %v373_v16, 3  ;;  %vm92_vm4 = vcmp.lt.s32.totalorder %v373_v16, 2  ;;  %v75_v54 = vshrl.u32 %v330_v18, %v74_v17 }
  0x25   :  { %v78_v35 = vor.u32 %v77_v28, %v76_v19  ;;  %v81_v36 = vor.u32 %v80_v29, %v79_v21  ;;  %v84_v37 = vor.u32 %v83_v30, %v82_v23  ;;  %v87_v38 = vor.u32 %v86_v31, %v85_v25 }
  0x26   :  { %v90_v39 = vor.u32 %v89_v33, %v88_v27 }
  0x27   :  { %v99_v40 = vsel %vm91_vm1, %v78_v35, %v81_v36  ;;  %v103_v41 = vsel %vm91_vm1, %v81_v36, %v84_v37  ;;  %v100_v42 = vsel %vm94_vm2, %v87_v38, 920167782  ;;  %v95_v3 = vsel %vm91_vm1, %v75_v54, %v78_v35 }
  0x28   :  { %v104_v43 = vsel %vm94_vm2, %v90_v39, 1326507024  ;;  %v101_v44 = vsel %vm93_vm3, %v84_v37, %v100_v42  ;;  %v96_v5 = vsel %vm94_vm2, %v84_v37, 2102212464  ;;  %vm202_vm1 = vweird.f32 %v367_v6 }
  0x29   :  { %v105_v45 = vsel %vm93_vm3, %v87_v38, %v104_v43  ;;  %v102_v48 = vsel %vm92_vm4, %v99_v40, %v101_v44  ;;  %v97_v18 = vsel %vm93_vm3, %v81_v36, %v96_v5  ;;  %vm215_vm2 = vcmask 523264  }
  0x2a   :  { %v106_v49 = vsel %vm92_vm4, %v103_v41, %v105_v45  ;;  %v132_v52 = vand.u32 65535, %v102_v48  ;;  %v133_v53 = vshrl.u32 %v102_v48, 16  ;;  %v98_v26 = vsel %vm92_vm4, %v95_v3, %v97_v18  ;;  %v213_v18 = vld [vmem:[#allocation2] sm:$0xff] }
  0x2b   :  { %v110_v50 = vand.u32 65535, %v106_v49  ;;  %v111_v51 = vshrl.u32 %v106_v49, 16  ;;  %v152_v30 = vmul.u32 %v376_v34, %v98_v26 }
  0x2c   :  { %v134_v58 = vmul.u32 %v132_v52, %v108_v46  ;;  %v135_v59 = vmul.u32 %v133_v53, %v108_v46  ;;  %v136_v60 = vmul.u32 %v132_v52, %v109_v47  ;;  %v137_v0 = vmul.u32 %v133_v53, %v109_v47 }
  0x2d   :  { %v112_v55 = vmul.u32 %v110_v50, %v108_v46  ;;  %v113_v56 = vmul.u32 %v111_v51, %v108_v46  ;;  %v114_v57 = vmul.u32 %v110_v50, %v109_v47  ;;  %v115_v61 = vmul.u32 %v111_v51, %v109_v47 }
  0x2e   :  { %v138_v1 = vshll.u32 %v135_v59, 16  ;;  %v140_v2 = vshll.u32 %v136_v60, 16  ;;  %v139_v15 = vshrl.u32 %v135_v59, 16  ;;  %v141_v22 = vshrl.u32 %v136_v60, 16 }
  0x2f   :  { %v116_v62 = vshll.u32 %v113_v56, 16  ;;  %v118_v63 = vshll.u32 %v114_v57, 16  ;;  %v117_v11 = vshrl.u32 %v113_v56, 16  ;;  %v119_v19 = vshrl.u32 %v114_v57, 16 }
  0x30   :  { %vm142_vm6 = vc.u32 %v134_v58, %v138_v1  ;;  %v144_v10 = vadd.s32 %v138_v1, %v134_v58 }
  0x31   :  { %vm120_vm5 = vc.u32 %v112_v55, %v116_v62  ;;  %v122_v4 = vadd.s32 %v116_v62, %v112_v55  ;;  %v143_v13 = vsel %vm142_vm6, 1, %v336_v7 }
  0x32   :  { %v121_v8 = vsel %vm120_vm5, 1, %v336_v7  ;;  %v145_v17 = vadd.s32 %v143_v13, %v137_v0  ;;  %vm146_vm8 = vc.u32 %v144_v10, %v140_v2  ;;  %v148_v25 = vadd.s32 %v144_v10, %v140_v2 }
  0x33   :  { %v123_v12 = vadd.s32 %v121_v8, %v115_v61  ;;  %vm124_vm7 = vc.u32 %v122_v4, %v118_v63  ;;  %v147_v21 = vsel %vm146_vm8, 1, %v336_v7 }
  0x34   :  { %v125_v14 = vsel %vm124_vm7, 1, %v336_v7  ;;  %v149_v23 = vadd.s32 %v147_v21, %v145_v17 }
  0x35   :  { %v127_v20 = vadd.s32 %v125_v14, %v123_v12 }
  0x36   :  { %v150_v27 = vadd.s32 %v149_v23, %v139_v15 }
  0x37   :  { %v128_v24 = vadd.s32 %v127_v20, %v117_v11 }
  0x38   :  { %v151_v29 = vadd.s32 %v150_v27, %v141_v22 }
  0x39   :  { %v129_v28 = vadd.s32 %v128_v24, %v119_v19 }
  0x3a   :  { %v155_v31 = vadd.s32 1, %v151_v29 }
  0x3b   :  { %vm154_vm9 = vc.u32 %v129_v28, %v148_v25  ;;  %v153_v16 = vadd.s32 %v148_v25, %v129_v28 }
  0x3c   :  { %v156_v32 = vsel %vm154_vm9, %v155_v31, %v151_v29 }
  0x3d   :  { %v157_v33 = vadd.s32 %v156_v32, %v152_v30 }
  0x3f   :  { %v158_v35 = vadd.s32 536870912, %v157_v33 }
  0x41   :  { %v159_v36 = vshrl.u32 %v158_v35, 30 }
  0x43   :  { %v160_v37 = vshll.u32 %v159_v36, 30  ;;  %v183_v57 = vsub.s32 4, %v159_v36 }
  0x45   :  { %v161_v38 = vsub.s32 %v157_v33, %v160_v37  ;;  %v184_v62 = vsel %vm61_vm12, %v183_v57, %v159_v36 }
  0x46   :  { %v186_v1 = vsel %vm411_vm13, 0, %v184_v62 }
  0x47   :  { %vm162_vm10 = vcmp.lt.s32.totalorder %v161_v38, 0  ;;  %v163_v39 = vsub.s32 0, %v161_v38  ;;  %v203_v5 = vand.u32 3, %v186_v1 }
  0x49   :  { %v164_v40 = vsel %vm162_vm10, %v163_v39, %v161_v38  ;;  %vm208_vm14 = vcmp.eq.s32.totalorder %v203_v5, 2  ;;  %vm205_vm15 = vcmp.eq.s32.totalorder %v203_v5, 0  ;;  %vm204_vm0 = vcmp.lt.s32.totalorder %v203_v5, 2 }
  0x4a   :  { %v165_v41 = vclz %v164_v40 }
  0x4c   :  { %v236_v42 = vadd.s32 4294967294, %v165_v41 }
  0x4e   :  { %vm237_vm11 = vcmp.lt.s32.totalorder %v236_v42, 0 }
  0x4f   :  { %v168_v43 = vsel %vm237_vm11, 0, %v236_v42 }
  0x50   :  { %v169_v44 = vsub.s32 32, %v168_v43  ;;  %v170_v45 = vshll.u32 %v161_v38, %v168_v43  ;;  %v173_v46 = vsub.s32 4294967266, %v168_v43 }
  0x52   :  { %v171_v34 = vshrl.u32 %v153_v16, %v169_v44  ;;  %v174_v47 = vadd.s32 127, %v173_v46 }
  0x54   :  { %v172_v48 = vor.u32 %v171_v34, %v170_v45  ;;  %v175_v49 = vshll.u32 %v174_v47, 23 }
  0x56   :  { %v176_v50 = vor.u32 4788187, %v175_v49  ;;  %v179_v51 = vcvt.s32.f32 %v172_v48 }
  0x58   :  { %v177_v52 = vand.u32 2147483647, %v176_v50 }
  0x5a   :  { %v180_v53 = vmul.f32 %v179_v51, %v177_v52 }
  0x5c   :  { %v181_v55 = vxor.u32 2147483648, %v180_v53 }
  0x5e   :  { %v182_v56 = vsel %vm61_vm12, %v181_v55, %v180_v53 }
  0x5f   :  { %v185_v58 = vsel %vm411_vm13, %v367_v6, %v182_v56 }
  0x60   :  { %v187_v59 = vmul.f32 %v185_v58, %v185_v58 }
  0x62   :  { %v188_v60 = vmul.f32 -0.001358992, %v187_v59  ;;  %v195_v61 = vmul.f32 -0.00019511016, %v187_v59 }
  0x64   :  { %v189_v63 = vadd.f32 0.041655596, %v188_v60  ;;  %v196_v0 = vadd.f32 0.008332121, %v195_v61 }
  0x66   :  { %v190_v9 = vmul.f32 %v189_v63, %v187_v59  ;;  %v197_v2 = vmul.f32 %v196_v0, %v187_v59 }
  0x68   :  { %v191_v3 = vadd.f32 -0.4999988, %v190_v9  ;;  %v198_v4 = vadd.f32 -0.16666654, %v197_v2 }
  0x6a   :  { %v192_v7 = vmul.f32 %v191_v3, %v187_v59  ;;  %v199_v8 = vmul.f32 %v198_v4, %v187_v59 }
  0x6c   :  { %v193_v10 = vadd.f32 1.0, %v192_v7  ;;  %v200_v11 = vadd.f32 1.0, %v199_v8 }
  0x6e   :  { %v201_v12 = vmul.f32 %v200_v11, %v185_v58  ;;  %v209_v13 = vxor.u32 2147483648, %v193_v10 }
  0x70   :  { %v206_v14 = vxor.u32 2147483648, %v201_v12  ;;  %v210_v15 = vsel %vm208_vm14, %v209_v13, %v201_v12 }
  0x72   :  { %v207_v17 = vsel %vm205_vm15, %v193_v10, %v206_v14 }
  0x73   :  { %v211_v19 = vsel %vm204_vm0, %v207_v17, %v210_v15 }
  0x74   :  { %v212_v20 = vsel %vm202_vm1, nan, %v211_v19 }
  0x75   :  { %v214_v21 = vadd.f32 %v213_v18, %v212_v20 }
  0x77   :  { %216 = vst.msk [vmem:[#allocation7] sm:$0xff] %vm215_vm2, %v214_v21 }
  0x78   :  { %227 = dma.vmem_to_hbm [thread:$0]  %s223_s2, 128, %s225_s25, [#allocation4]  }
  0x79   :  { %326 = dma.done.wait [#allocation4], 128  }
  0x7a   :  { %327 = vsyncadd [#allocation4], 4294967168 }
  0x7b   :  { %232 = vsyncpa [#allocation3], 1 }
  0x7c   :  { %233 = vsyncpa [#allocation6], 1 }
  0x7d   :  { %234 = vsyncpa [#allocation4], 1 }

</bundles_post_ra>
